<compile_context>
chip_gen: v7x
topology: tpu7x:2x2x1
jax: 0.10.0
libtpu: 0.0.40
codegen_flags: <defaults>
</compile_context>

<pallas_src>
import functools

import jax
import jax.numpy as jnp
from jax.experimental import pallas as pl
from jax.experimental.pallas import tpu as pltpu

# Scoped-VMEM cap: big enough for the enlarged soft-path tiles, small enough
# to leave headroom on v7x (64 MiB physical VMEM per core).
_VMEM_LIMIT_BYTES = 48 * 1024 * 1024


def _round_up(a: int, b: int) -> int:
    return (a + b - 1) // b * b


def _largest_divisor_leq(n: int, cap: int) -> int:
    for d in range(min(n, cap), 0, -1):
        if n % d == 0:
            return d
    return 1


def _seqs_per_block(batch: int, l_pad: int, target_rows: int) -> int:
    """Whole padded sequences per tile, preferring no batch padding/copies."""
    max_seqs = max(1, target_rows // l_pad)
    if batch <= max_seqs:
        return batch
    d = _largest_divisor_leq(batch, max_seqs)
    return d if d >= max(1, max_seqs // 2) else max_seqs


def _pick_tn(h_pad128: int) -> int:
    """256-wide N tiles on 256-wide MXUs (v6e/v7x); 128 on v5e and older."""
    if h_pad128 < 256 or h_pad128 % 256 != 0:
        return 128
    try:
        kind = jax.devices()[0].device_kind.lower()
    except Exception:
        kind = ""
    if any(v in kind for v in ("v2", "v3", "v4", "v5")):
        return 128
    return 256


# --------------------------------------------------------------------------- #
# Soft / distributional path: (B*L, V) @ (V, H) + positional  (tiled matmul)
# --------------------------------------------------------------------------- #
def _soft_matmul_kernel(x_ref, w_ref, p_ref, o_ref, *, compute_dtype):
    # x_ref: (tm, tk) f32/bf16   w_ref: (tk, tn) bf16/f32
    # p_ref: (l_pad, tn) f32 (resident per n column)   o_ref: (tm, tn) f32
    # The f32 output block doubles as the K accumulator: its index_map ignores
    # k, so Pallas keeps it resident in VMEM across the whole reduction.
    k = pl.program_id(2)

    @pl.when(k == 0)
    def _init():
        o_ref[...] = jnp.zeros_like(o_ref)

    # In-kernel cast: the big activation stays f32 in HBM (no wrapper-side
    # pad+cast pass over it) while the MXU is fed bf16 with f32 accumulation.
    o_ref[...] += jnp.dot(x_ref[...].astype(compute_dtype),
                          w_ref[...].astype(compute_dtype),
                          preferred_element_type=jnp.float32)

    @pl.when(k == pl.num_programs(2) - 1)
    def _finalize():
        acc = o_ref[...]
        tm, tn = acc.shape
        l_pad = p_ref.shape[0]
        reps = tm // l_pad
        # Each M tile holds `reps` whole (padded) sequences back to back:
        # broadcast-add the positional rows (no tiled copy of the table,
        # added once per output tile, hoisted out of the K reduction).
        acc = acc.reshape(reps, l_pad, tn) + p_ref[...][None]
        o_ref[...] = acc.reshape(tm, tn)


def sas_embed_soft(x_soft, token_w, pos_w, *,
                   tm_target=512, tk_target=1024, tn=None,
                   compute_dtype=jnp.bfloat16):
    """x_soft @ token_w + pos_w (broadcast over batch), MXU-tiled.

    NOTE: compute_dtype=jnp.bfloat16 feeds the MXU bf16 (f32 accumulation),
    which differs from a pure f32 matmul at ~1e-3 relative level.  Pass
    compute_dtype=jnp.float32 if bit-parity with the PyTorch reference matters.
    """
    B, L, V = x_soft.shape
    Vw, H = token_w.shape
    assert V == Vw and pos_w.shape[0] >= L and pos_w.shape[1] == H

    l_pad = _round_up(L, 8)
    h_pad128 = _round_up(H, 128)
    if tn is None:
        tn = _pick_tn(h_pad128)
    h_pad = _round_up(H, tn)                    # lane-dense output blocks

    # K tiling: no padding when the whole reduction fits in one K step.
    if V <= tk_target:
        tk, v_pad = V, V
    else:
        tk = _round_up(tk_target, 128)
        v_pad = _round_up(V, tk)

    # M tiling: whole (padded) sequences per tile; prefer a divisor of B so
    # the large activation needs no wrapper-side pad/copy at all.
    seqs = _seqs_per_block(B, l_pad, tm_target)
    tm = seqs * l_pad
    b_pad = _round_up(B, seqs)
    m_pad = b_pad * l_pad

    needs_x_pad = (b_pad != B) or (l_pad != L) or (v_pad != V)
    if needs_x_pad:
        # Padding forces a copy anyway -> cast to bf16 in the same pass so the
        # kernel re-reads 2 B/elem instead of 4.
        x_p = jnp.zeros((b_pad, l_pad, v_pad), compute_dtype)
        x_p = x_p.at[:B, :L, :V].set(x_soft.astype(compute_dtype))
        x_p = x_p.reshape(m_pad, v_pad)
    else:
        # No copy: the kernel casts each (tm, tk) block on the fly.
        x_p = x_soft.reshape(m_pad, v_pad)

    # The (V, H) table is re-streamed per M tile, so a one-time bf16 copy is a
    # net bandwidth win (it is small relative to x anyway).
    if (v_pad != V) or (h_pad != H):
        w_p = jnp.zeros((v_pad, h_pad), compute_dtype)
        w_p = w_p.at[:V, :H].set(token_w.astype(compute_dtype))
    else:
        w_p = token_w.astype(compute_dtype)

    p_p = jnp.zeros((l_pad, h_pad), jnp.float32)
    p_p = p_p.at[:L, :H].set(pos_w[:L].astype(jnp.float32))

    grid = (m_pad // tm, h_pad // tn, v_pad // tk)
    kernel = functools.partial(_soft_matmul_kernel, compute_dtype=compute_dtype)

    cost = pl.CostEstimate(
        flops=2 * m_pad * v_pad * h_pad,
        transcendentals=0,
        bytes_accessed=(x_p.size * x_p.dtype.itemsize
                        + w_p.size * w_p.dtype.itemsize
                        + p_p.size * 4
                        + m_pad * h_pad * 4),
    )

    out = pl.pallas_call(
        kernel,
        out_shape=jax.ShapeDtypeStruct((m_pad, h_pad), jnp.float32),
        grid_spec=pltpu.PrefetchScalarGridSpec(
            num_scalar_prefetch=0,
            grid=grid,
            in_specs=[
                pl.BlockSpec((tm, tk), lambda m, n, k: (m, k)),
                pl.BlockSpec((tk, tn), lambda m, n, k: (k, n)),
                pl.BlockSpec((l_pad, tn), lambda m, n, k: (0, n)),  # resident
            ],
            out_specs=pl.BlockSpec((tm, tn), lambda m, n, k: (m, n)),
        ),
        compiler_params=pltpu.CompilerParams(
            dimension_semantics=("parallel", "parallel", "arbitrary"),
            vmem_limit_bytes=_VMEM_LIMIT_BYTES,
        ),
        cost_estimate=cost,
    )(x_p, w_p, p_p)

    return out.reshape(b_pad, l_pad, h_pad)[:B, :L, :H]


# --------------------------------------------------------------------------- #
# Integer-index path: blocked embedding gather (manual row DMAs, no one-hot)
# --------------------------------------------------------------------------- #
def _gather_block_kernel(ids_ref, w_hbm, p_ref, o_ref, rows_ref, sem):
    # ids_ref : SMEM (m_pad,) int32, scalar-prefetched (already clipped).
    # w_hbm   : (V, h) f32 token table left in HBM (memory_space=pl.ANY).
    # p_ref   : (l_pad, h) f32 positional table, fully VMEM-resident.
    # o_ref   : (tl, h) f32 output block; tl = reps * l_pad whole sequences.
    # rows_ref: (tl, h) f32 VMEM row buffer;  sem: byte-counted DMA semaphore.
    tl, h = rows_ref.shape
    l_pad = p_ref.shape[0]
    reps = tl // l_pad
    base = pl.program_id(0) * tl

    # Fire one row DMA per token in the block; all copies signal the same
    # DMA semaphore, so they can land out of order.
    @pl.loop(0, tl)
    def _issue(t):
        row = ids_ref[base + t]
        pltpu.make_async_copy(w_hbm.at[row], rows_ref.at[t], sem).start()

    # Drain: one wait per issued row (descriptor shape matches the issue, so
    # the byte accounting matches exactly).
    @pl.loop(0, tl)
    def _drain(t):
        pltpu.make_async_copy(w_hbm.at[0], rows_ref.at[t], sem).wait()

    # Gathered token rows + positional rows, exact f32.
    out = rows_ref[...].reshape(reps, l_pad, h) + p_ref[...][None]
    o_ref[...] = out.reshape(tl, h)


def sas_embed_gather(x_ids, token_w, pos_w, *, tl_target=128):
    """token_w[x_ids] + pos_w, a block of whole sequences per grid step."""
    B, L = x_ids.shape
    V, H = token_w.shape
    assert pos_w.shape[0] >= L and pos_w.shape[1] == H

    l_pad = _round_up(L, 8)
    h_pad = _round_up(H, 128)                   # lane-dense rows

    # Only touch the embedding table if its lane dim needs padding (or it is
    # not f32); never pad the vocab axis (row DMAs don't care about V).
    if (h_pad != H) or (token_w.dtype != jnp.float32):
        w_p = jnp.zeros((V, h_pad), jnp.float32)
        w_p = w_p.at[:, :H].set(token_w.astype(jnp.float32))
    else:
        w_p = token_w

    p_p = jnp.zeros((l_pad, h_pad), jnp.float32)
    p_p = p_p.at[:L, :H].set(pos_w[:L].astype(jnp.float32))

    # Block = whole (padded) sequences, >= 8 rows per grid step.
    seqs = _seqs_per_block(B, l_pad, tl_target)
    tl = seqs * l_pad
    b_pad = _round_up(B, seqs)
    m_pad = b_pad * l_pad

    ids = jnp.zeros((b_pad, l_pad), jnp.int32)
    ids = ids.at[:B, :L].set(x_ids.astype(jnp.int32))
    ids = jnp.clip(ids, 0, V - 1).reshape(m_pad)   # guard against OOB row DMAs

    cost = pl.CostEstimate(
        flops=m_pad * h_pad,
        transcendentals=0,
        bytes_accessed=2 * m_pad * h_pad * 4 + l_pad * h_pad * 4 + m_pad * 4,
    )

    out = pl.pallas_call(
        _gather_block_kernel,
        out_shape=jax.ShapeDtypeStruct((m_pad, h_pad), jnp.float32),
        grid_spec=pltpu.PrefetchScalarGridSpec(
            num_scalar_prefetch=1,                       # ids -> SMEM
            grid=(m_pad // tl,),
            in_specs=[
                pl.BlockSpec(memory_space=pl.ANY),       # token table in HBM
                pl.BlockSpec((l_pad, h_pad), lambda i, ids: (0, 0)),  # resident
            ],
            out_specs=pl.BlockSpec((tl, h_pad), lambda i, ids: (i, 0)),
            scratch_shapes=[
                pltpu.VMEM((tl, h_pad), jnp.float32),    # gathered rows
                pltpu.SemaphoreType.DMA,                 # one byte-counted sem
            ],
        ),
        compiler_params=pltpu.CompilerParams(
            dimension_semantics=("parallel",),
            vmem_limit_bytes=_VMEM_LIMIT_BYTES,
        ),
        cost_estimate=cost,
    )(ids, w_p, p_p)

    return out.reshape(b_pad, l_pad, h_pad)[:B, :L, :H]


# --------------------------------------------------------------------------- #
# Module-level glue (mask construction, dropout)
# --------------------------------------------------------------------------- #
def sas_embedding_forward(x, token_w, pos_w, *, compute_dtype=jnp.bfloat16):
    """Mirror of SASEmbedding.forward -> (dropout(embedding), mask)."""
    if x.ndim > 2:
        B, L, _ = x.shape
        # get_mask replaces x by ones(B, L) -> everything > 0 -> all True.
        mask = jnp.ones((B, 1, L, L), dtype=bool)
        out = sas_embed_soft(x, token_w, pos_w, compute_dtype=compute_dtype)
    else:
        B, L = x.shape
        # mask[b, 0, i, j] = (x[b, j] > 0)
        mask = jnp.broadcast_to((x > 0)[:, None, :], (B, L, L))[:, None, :, :]
        out = sas_embed_gather(x, token_w, pos_w)
    # TODO(synk): training-mode nn.Dropout (stochastic, via pltpu.prng_seed /
    # prng_random_bits fused on the output tile) not implemented; eval-mode
    # dropout is the identity, which is what we return.
    return out, mask


def init_params(key, num_items, hidden, max_len):
    vocab = num_items + 1
    k_tok, k_pos = jax.random.split(key)
    token_w = jax.random.normal(k_tok, (vocab, hidden), jnp.float32) * 0.02
    token_w = token_w.at[0].set(0.0)  # nn.Embedding(padding_idx=0)
    pos_w = jax.random.normal(k_pos, (max_len, hidden), jnp.float32) * 0.02
    return token_w, pos_w


# --------------------------------- Demo ------------------------------------ #
if __name__ == "__main__":
    num_items = 63        # vocab = 64
    hidden = 32           # bert_hidden_units
    max_len = 8           # bert_max_len
    batch = 2

    key = jax.random.PRNGKey(0)
    k_params, k_idx, k_soft = jax.random.split(key, 3)
    token_w, pos_w = init_params(k_params, num_items, hidden, max_len)

    # Path 1: integer item-id sequences (B, L), with some padding zeros.
    x_ids = jax.random.randint(k_idx, (batch, max_len), 0, num_items + 1,
                               dtype=jnp.int32)
    emb_ids, mask_ids = sas_embedding_forward(x_ids, token_w, pos_w)
    emb_ids = jax.block_until_ready(emb_ids)
    mask_ids = jax.block_until_ready(mask_ids)

    # Path 2: soft (distributional) input (B, L, V).
    x_soft = jax.nn.softmax(
        jax.random.normal(k_soft, (batch, max_len, num_items + 1), jnp.float32),
        axis=-1,
    )
    emb_soft, mask_soft = sas_embedding_forward(x_soft, token_w, pos_w)
    emb_soft = jax.block_until_ready(emb_soft)
    mask_soft = jax.block_until_ready(mask_soft)

    # Shape checks against the PyTorch semantics.
    assert emb_ids.shape == (batch, max_len, hidden)
    assert mask_ids.shape == (batch, 1, max_len, max_len)
    assert mask_ids.dtype == jnp.bool_
    assert emb_soft.shape == (batch, max_len, hidden)
    assert mask_soft.shape == (batch, 1, max_len, max_len)

    # Integer path: exact f32 gather + f32 add.
    ref_ids = token_w[x_ids] + pos_w[None, :, :]
    assert jnp.allclose(emb_ids, ref_ids, atol=1e-6)

    # Soft path: kernel feeds the MXU bf16 inputs with f32 accumulation.
    xb = x_soft.astype(jnp.bfloat16).astype(jnp.float32)
    wb = token_w.astype(jnp.bfloat16).astype(jnp.float32)
    ref_soft_bf16 = jnp.einsum("blv,vh->blh", xb, wb) + pos_w[None, :, :]
    ref_soft_f32 = jnp.einsum("blv,vh->blh", x_soft, token_w) + pos_w[None, :, :]
    assert jnp.allclose(emb_soft, ref_soft_bf16, atol=1e-5)
    assert jnp.allclose(emb_soft, ref_soft_f32, atol=5e-3)

    assert bool(jnp.all(mask_ids[:, 0, 0, :] == (x_ids > 0)))

    print("KERNEL_OK")
</pallas_src>

<mosaic_0001>
module attributes {stable_mosaic.version = 11 : i64} {
  func.func @_gather_block_kernel(%arg0: i32, %arg1: memref<16xi32, #tpu.memory_space<smem>>, %arg2: memref<64x128xf32, #tpu.memory_space<any>>, %arg3: memref<8x128xf32, #tpu.memory_space<vmem>>, %arg4: memref<16x128xf32, #tpu.memory_space<vmem>>, %arg5: memref<16x128xf32, #tpu.memory_space<vmem>>, %arg6: memref<!tpu.dma_semaphore, #tpu.memory_space<semaphore_mem>>) attributes {dimension_semantics = [#tpu.dimension_semantics<parallel>], iteration_bounds = array<i64: 1>, scalar_prefetch = 1 : i64, scratch_operands = 2 : i64, tpu.core_type = #tpu.core_type<tc>, window_params = [{}, {pipeline_mode = #tpu.pipeline_mode<synchronous>, transform_indices = @transform_1, window_bounds = array<i64: 8, 128>}, {transform_indices = @transform_2, window_bounds = array<i64: 16, 128>}]} {
    %c16_i32 = arith.constant 16 : i32
    %0 = arith.muli %arg0, %c16_i32 : i32
    %c0_i32 = arith.constant 0 : i32
    %c16_i32_0 = arith.constant 16 : i32
    %1 = arith.addi %c0_i32, %c16_i32_0 : i32
    %c1_i32 = arith.constant 1 : i32
    scf.for %arg7 = %c0_i32 to %1 step %c1_i32  : i32 {
      %c1_i32_11 = arith.constant 1 : i32
      %11 = arith.muli %arg7, %c1_i32_11 : i32
      %c0_i32_12 = arith.constant 0 : i32
      %12 = arith.addi %c0_i32_12, %11 : i32
      %13 = arith.addi %0, %12 : i32
      %14 = arith.index_cast %13 : i32 to index
      %15 = memref.load %arg1[%14] : memref<16xi32, #tpu.memory_space<smem>>
      %c0_i32_13 = arith.constant 0 : i32
      %16 = tpu.memref_slice %arg2[%15, %c0_i32_13] : memref<64x128xf32, #tpu.memory_space<any>> -> memref<1x128xf32, #tpu.memory_space<any>>
      %17 = tpu.memref_squeeze %16 : memref<1x128xf32, #tpu.memory_space<any>> -> memref<128xf32, #tpu.memory_space<any>>
      %c0_i32_14 = arith.constant 0 : i32
      %18 = tpu.memref_slice %arg5[%12, %c0_i32_14] : memref<16x128xf32, #tpu.memory_space<vmem>> -> memref<1x128xf32, #tpu.memory_space<vmem>>
      %19 = tpu.memref_squeeze %18 : memref<1x128xf32, #tpu.memory_space<vmem>> -> memref<128xf32, #tpu.memory_space<vmem>>
      tpu.enqueue_dma source(%17 : memref<128xf32, #tpu.memory_space<any>>) target(%19 : memref<128xf32, #tpu.memory_space<vmem>>) target_semaphore(%arg6 : memref<!tpu.dma_semaphore, #tpu.memory_space<semaphore_mem>>)
    }
    %c16_i32_1 = arith.constant 16 : i32
    %c0_i32_2 = arith.constant 0 : i32
    %c16_i32_3 = arith.constant 16 : i32
    %2 = arith.addi %c0_i32_2, %c16_i32_3 : i32
    %c1_i32_4 = arith.constant 1 : i32
    scf.for %arg7 = %c0_i32_2 to %2 step %c1_i32_4  : i32 {
      %c1_i32_11 = arith.constant 1 : i32
      %11 = arith.muli %arg7, %c1_i32_11 : i32
      %c0_i32_12 = arith.constant 0 : i32
      %12 = arith.addi %c0_i32_12, %11 : i32
      %c0_i32_13 = arith.constant 0 : i32
      %c0_i32_14 = arith.constant 0 : i32
      %13 = tpu.memref_slice %arg2[%c0_i32_13, %c0_i32_14] : memref<64x128xf32, #tpu.memory_space<any>> -> memref<1x128xf32, #tpu.memory_space<any>>
      %14 = tpu.memref_squeeze %13 : memref<1x128xf32, #tpu.memory_space<any>> -> memref<128xf32, #tpu.memory_space<any>>
      %c0_i32_15 = arith.constant 0 : i32
      %15 = tpu.memref_slice %arg5[%12, %c0_i32_15] : memref<16x128xf32, #tpu.memory_space<vmem>> -> memref<1x128xf32, #tpu.memory_space<vmem>>
      %16 = tpu.memref_squeeze %15 : memref<1x128xf32, #tpu.memory_space<vmem>> -> memref<128xf32, #tpu.memory_space<vmem>>
      tpu.wait_dma2 semaphore(%arg6 : memref<!tpu.dma_semaphore, #tpu.memory_space<semaphore_mem>>) src(%14 : memref<128xf32, #tpu.memory_space<any>>) dst(%16 : memref<128xf32, #tpu.memory_space<vmem>>)
    }
    %c16_i32_5 = arith.constant 16 : i32
    %c0 = arith.constant 0 : index
    %c0_6 = arith.constant 0 : index
    %3 = vector.load %arg5[%c0, %c0_6] : memref<16x128xf32, #tpu.memory_space<vmem>>, vector<16x128xf32>
    %4 = vector.shape_cast %3 : vector<16x128xf32> to vector<2x8x128xf32>
    %c0_7 = arith.constant 0 : index
    %c0_8 = arith.constant 0 : index
    %5 = vector.load %arg3[%c0_7, %c0_8] : memref<8x128xf32, #tpu.memory_space<vmem>>, vector<8x128xf32>
    %6 = vector.shape_cast %5 : vector<8x128xf32> to vector<1x8x128xf32>
    %7 = vector.broadcast %6 : vector<1x8x128xf32> to vector<2x8x128xf32>
    %8 = arith.addf %4, %7 : vector<2x8x128xf32>
    %9 = vector.shape_cast %8 : vector<2x8x128xf32> to vector<16x128xf32>
    %c0_9 = arith.constant 0 : index
    %c0_10 = arith.constant 0 : index
    %10 = vector.load %arg4[%c0_9, %c0_10] : memref<16x128xf32, #tpu.memory_space<vmem>>, vector<16x128xf32>
    tpu.vector_store %arg4[%c0_9, %c0_10], %9 {strides = array<i32>} : memref<16x128xf32, #tpu.memory_space<vmem>>, vector<16x128xf32>,
    return
  }
  func.func @transform_1(%arg0: i32, %arg1: memref<16xi32, #tpu.memory_space<smem>>) -> (i32, i32) {
    %c0_i32 = arith.constant 0 : i32
    %c0_i32_0 = arith.constant 0 : i32
    %c0_i32_1 = arith.constant 0 : i32
    return %c0_i32, %c0_i32_0 : i32, i32
  }
  func.func @transform_2(%arg0: i32, %arg1: memref<16xi32, #tpu.memory_space<smem>>) -> (i32, i32) {
    %c0_i32 = arith.constant 0 : i32
    %c0_i32_0 = arith.constant 0 : i32
    return %arg0, %c0_i32 : i32, i32
  }
}

</mosaic_0001>

<bundles_post_ra>
// kernel: tpu_custom_call.1
= control target key start
LH: loop header
LB: loop body
LE: loop exit
PB: predicated region body
PF: predicated region fallthrough
CT: control target
= control target key end

     0   :  { %s307_s0 = inlined_call_operand.hbm [shape: s32[16], index: 0, kind: input, shape index: {}]   ;;  %s308_s1 = inlined_call_operand.hbm [shape: f32[64,128], index: 1, kind: input, shape index: {}]   ;;  %s309_s2 = inlined_call_operand.hbm [shape: f32[8,128], index: 2, kind: input, shape index: {}]   ;;  %s310_s3 = inlined_call_operand.hbm [shape: f32[16,128], index: 3, kind: output, shape index: {}]  }
   0x1   :  { %s124_s14 = scalar_lea.hbm %s307_s0, 16 }
   0x2   :  { %p125_p0 = scmp.ne.s32.totalorder %s307_s0, %s124_s14  ;;  %p128_p1 = scmp.lt.u32.totalorder %s124_s14, %s307_s0 }
   0x4   :  { %p130_p2 = pnand %p128_p1, %p125_p0 }
   0x6   :  { %133 = shalt.err (!%p130_p2)  }
   0x7   :  { %s226_s19 = smov [#allocation5]  }
   0x8   :  { %9 = dma.hbm_to_smem %s307_s0, 16, %s226_s19, [#allocation4] }
   0x9   :  { %210 = dma.done.wait [#allocation4], 16 }
   0xa   :  { %211 = vsyncadd [#allocation4], 4294967280 }
   0xb   :  { %11 = sfence }
   0xc   :  { %12 = vsyncpa [#allocation7], 0 }
   0xd   :  { %13 = vsyncpa [#allocation8], 0  ;;  %s227_s22 = smov [#allocation6]   ;;  %s134_s26 = scalar_lea.hbm %s309_s2, 128 }
   0xe   :  { %s20_s23 = sshll.u32 %s227_s22, 4  ;;  %p135_p3 = scmp.ne.s32.totalorder %s309_s2, %s134_s26  ;;  %s21_s23 = int_to_ptr.vmem [resolvable:$true] %s20_s23 }
   0xf   :  { %p138_p4 = scmp.lt.u32.totalorder %s134_s26, %s309_s2 }
  0x11   :  { %p140_p5 = pnand %p138_p4, %p135_p3 }
  0x13   :  { %143 = shalt.err (!%p140_p5)
}
  0x14   :  { %s144_s0 = scalar_lea.vmem %s21_s23, 128  ;;  %p149_p7 = scmp.lt.s32.totalorder %s21_s23, %s21_s23 }
  0x15   :  { %p145_p6 = scmp.ne.s32.totalorder %s21_s23, %s144_s0  ;;  %p150_p8 = scmp.lt.s32.totalorder %s144_s0, %s144_s0 }
  0x17   :  { %p151_p9 = por %p150_p8, %p149_p7 }
  0x19   :  { %p152_p10 = pnand %p151_p9, %p145_p6 }
  0x1b   :  { %155 = shalt.err (!%p152_p10)
}
  0x1c   :  { %23 = dma.hbm_to_vmem [thread:$0]  %s309_s2, 128, %s21_s23, [#allocation7]  }
  0x1d   :  { %212 = dma.done.wait [#allocation7], 128  }
  0x1e   :  { %213 = vsyncadd [#allocation7], 4294967168  ;;  %s276_s6 = smov 0  }
  0x1f LB: > { %s35_s7 = sld [smem:[#allocation5 + %s220_s6]]  ;;  %s38_s8 = scalar_lea.vmem [#allocation2], %s220_s6  ;;  %s220_s6 = sphi %s276_s6, %s33_s6  }
  0x20   : > { %s46_s9 = sshll.u32 %s38_s8, 4  ;;  %s158_s16 = scalar_lea.hbm %s308_s1, 1024  ;;  %s47_s9 = int_to_ptr.vmem [resolvable:$true] %s46_s9 }
  0x25   : > { %s101_s10 = sshll.u32 %s35_s7, 4 }
  0x26   : > { %s37_s2 = scalar_lea.hbm %s308_s1, %s101_s10 }
  0x27   : > { %s156_s13 = scalar_lea.hbm %s37_s2, 16  ;;  %p159_p12 = scmp.lt.u32.totalorder %s37_s2, %s308_s1 }
  0x28   : > { %p157_p11 = scmp.ne.s32.totalorder %s37_s2, %s156_s13  ;;  %p160_p13 = scmp.lt.u32.totalorder %s158_s16, %s156_s13 }
  0x29   : > { %p162_p1 = scmp.lt.u32.totalorder %s156_s13, %s37_s2 }
  0x2a   : > { %p161_p0 = por %p160_p13, %p159_p12 }
  0x2c   : > { %p163_p2 = por %p162_p1, %p161_p0 }
  0x2e   : > { %p164_p3 = pnand %p163_p2, %p157_p11 }
  0x30   : > { %167 = shalt.err (!%p164_p3)  }
  0x31   : > { %s168_s19 = scalar_lea.vmem %s47_s9, 16  ;;  %s228_s20 = smov [#allocation2]  }
  0x32   : > { %p169_p4 = scmp.ne.s32.totalorder %s47_s9, %s168_s19  ;;  %s170_s21 = sshll.u32 %s228_s20, 4  ;;  %s171_s21 = int_to_ptr.vmem [resolvable:$false] %s170_s21 }
  0x33   : > { %s172_s22 = scalar_lea.vmem %s171_s21, 256  ;;  %p173_p5 = scmp.lt.s32.totalorder %s47_s9, %s171_s21 }
  0x34   : > { %p174_p6 = scmp.lt.s32.totalorder %s172_s22, %s168_s19 }
  0x36   : > { %p175_p7 = por %p174_p6, %p173_p5 }
  0x38   : > { %p176_p8 = pnand %p175_p7, %p169_p4 }
  0x3a   : > { %179 = shalt.err (!%p176_p8)  }
  0x3b   : > { %49 = dma.hbm_to_vmem [thread:$0]  %s37_s2, 16, %s47_s9, [#allocation3] }
  0x3c   : > { %s33_s6 = sadd.s32 1, %s220_s6  }
  0x3d   : > { %p30_p9 = scmp.ge.s32.totalorder %s33_s6, 16  }
  0x3e   :  { %s222_s23 = smov (%p30_p9), 0  }
  0x3f   :  { %32 = sbr.rel (!%p30_p9) target bundleno = 31 (0x1f), region = 48 }
  0x46 LB: > { %214 = dma.done.wait [#allocation3], 16  ;;  %s224_s23 = sphi %s222_s23, %s55_s23  }
  0x47   : > { %215 = vsyncadd [#allocation3], 4294967280  ;;  %s55_s23 = sadd.s32 1, %s224_s23  }
  0x48   : > { %p52_p10 = scmp.ge.s32.totalorder %s55_s23, 16  }
  0x49   :  { %v58_v0 = vld [vmem:[#allocation2] sm:$0xff] (%p52_p10)  ;;  %v60_v1 = vld [vmem:[#allocation6] sm:$0xff] (%p52_p10)  ;;  %v59_v2 = vld [vmem:[#allocation2 + $0x8] sm:$0xff] (%p52_p10)  ;;  %s229_s24 = smov (%p52_p10), [#allocation9]  }
  0x4a   :  { %54 = sbr.rel (!%p52_p10) target bundleno = 70 (0x46), region = 59  ;;  %v61_v3 = vadd.f32 (%p52_p10), %v60_v1, %v58_v0  ;;  %v62_v4 = vadd.f32 (%p52_p10), %v60_v1, %v59_v2  ;;  %s70_s25 = sshll.u32 (%p52_p10), %s229_s24, 4  ;;  %s71_s25 = int_to_ptr.vmem [resolvable:$true] %s70_s25 }
  0x4b   :  { %s180_s1 = scalar_lea.vmem (%p52_p10), %s71_s25, 256  ;;  %p185_p12 = scmp.lt.s32.totalorder (%p52_p10), %s71_s25, %s71_s25 }
  0x4c   :  { %63 = vst [vmem:[#allocation9] sm:$0xff] (%p52_p10), %v61_v3  ;;  %64 = vst [vmem:[#allocation9 + $0x8] sm:$0xff] (%p52_p10), %v62_v4  ;;  %p181_p11 = scmp.ne.s32.totalorder (%p52_p10), %s71_s25, %s180_s1  ;;  %p186_p13 = scmp.lt.s32.totalorder (%p52_p10), %s180_s1, %s180_s1 }
  0x4e   :  { %p187_p0 = por (%p52_p10), %p186_p13, %p185_p12 }
  0x50   :  { %p188_p1 = pnand (%p52_p10), %p187_p0, %p181_p11 }
  0x52   :  { %191 = shalt.err (!%p188_p1)
}
  0x53   :  { %s192_s28 = scalar_lea.hbm %s310_s3, 256 }
  0x54   :  { %p193_p2 = scmp.ne.s32.totalorder %s310_s3, %s192_s28  ;;  %p196_p3 = scmp.lt.u32.totalorder %s192_s28, %s310_s3 }
  0x56   :  { %p198_p4 = pnand %p196_p3, %p193_p2 }
  0x58   :  { %201 = shalt.err (!%p198_p4)
}
  0x59   :  { %s230_s5 = smov 128   ;;  %s231_s6 = smov 8  }
  0x5a   :  { %76 = dma.vmem_to_hbm [thread:$0]  %s71_s25, 256, %s310_s3, [#allocation8], %s230_s5, %s230_s5, %s231_s6  }
  0x5b   :  { %216 = dma.done.wait [#allocation8], 256  }
  0x5c   :  { %217 = vsyncadd [#allocation8], 4294967040 }
  0x5d   :  { %80 = vsyncpa [#allocation7], 1 }
  0x5e   :  { %81 = vsyncpa [#allocation8], 1 }
  0x5f   :  { %82 = vsyncmov [#allocation3] }
  0x62   :  { %s83_s9 = vpop.sfrf %82 }
  0x63   :  { %p102_p5 = scmp.ne.s32.totalorder %s83_s9, 0 }
  0x65   :  { %87 = shalt.err (%p102_p5)  }

</bundles_post_ra>
